<compile_context>
chip_gen: v7x
topology: tpu7x:2x2x1
jax: 0.10.0
libtpu: 0.0.40
codegen_flags: <defaults>
</compile_context>

<pallas_src>
import functools
import math

import jax
import jax.numpy as jnp
from jax.experimental import pallas as pl
from jax.experimental.pallas import tpu as pltpu


# ----------------------------------------------------------------------------
# Pallas kernel: fused two-branch MLP, transposed (features x rows) layout,
# 3 matmuls total, biases folded into the packed weights.
# ----------------------------------------------------------------------------
def _make_kernel(h2, h, oc, slab_rows):
    kin2 = h2 + h  # layer-2 contraction width

    def kernel(x_ref, w1c_ref, w2c_ref, w3c_ref, out_ref):
        xT = x_ref[...]                                        # (s+1, TM) bf16

        # Layer 1 (both branches merged; bias via the ones row of x).
        a1 = jnp.maximum(
            jnp.dot(w1c_ref[...], xT, preferred_element_type=jnp.float32),
            0.0)                                               # (h2+h, TM) f32

        # Layer 2 (both branches merged; bias = last weight column).
        w2c = w2c_ref[...]
        z2 = jnp.dot(w2c[:, :kin2], a1.astype(jnp.bfloat16),
                     preferred_element_type=jnp.float32)
        z2 = z2 + w2c[:, kin2:].astype(jnp.float32)            # (h+1, TM)
        logits = z2[h:h + 1, :]                                 # raw, no ReLU
        a2 = jnp.maximum(z2[:h, :], 0.0)                        # (h, TM)

        # Layer 3 (enc), output rows padded to slab_rows; bias = last column.
        w3c = w3c_ref[...]
        enc = jnp.tanh(
            jnp.dot(w3c[:, :h], a2.astype(jnp.bfloat16),
                    preferred_element_type=jnp.float32)
            + w3c[:, h:].astype(jnp.float32))                   # (slab_rows,TM)
        # rows oc..slab_rows-1 of w3c are zero -> tanh(0) = 0 there.

        # Single lane-dense slab store: row oc carries the logits.
        tm = enc.shape[1]
        row = jax.lax.broadcasted_iota(jnp.int32, (slab_rows, tm), 0)
        out_ref[...] = jnp.where(row == oc,
                                 jnp.broadcast_to(logits, (slab_rows, tm)),
                                 enc)

    return kernel


# ----------------------------------------------------------------------------
# Parameter init (plain JAX).  Weights stored [out, in] (PyTorch layout),
# biases stored [out, 1].  Kept as f32 masters.
# ----------------------------------------------------------------------------
def xavier_normal(key, fan_out, fan_in):
    std = math.sqrt(2.0 / (fan_in + fan_out))
    return std * jax.random.normal(key, (fan_out, fan_in), dtype=jnp.float32)


def init_u_embedding_params(key, s, c, hidden_size, output_size):
    h, h2 = hidden_size, hidden_size // 2
    keys = jax.random.split(key, 5)
    return {
        # model_u
        "w1u": xavier_normal(keys[0], h2, s),
        "b1u": jnp.zeros((h2, 1), jnp.float32),
        "w2u": xavier_normal(keys[1], 1, h2),
        "b2u": jnp.zeros((1, 1), jnp.float32),
        # model
        "w1": xavier_normal(keys[2], h, s),
        "b1": jnp.zeros((h, 1), jnp.float32),
        "w2": xavier_normal(keys[3], h, h),
        "b2": jnp.zeros((h, 1), jnp.float32),
        "w3": xavier_normal(keys[4], output_size * c, h),
        "b3": jnp.zeros((output_size * c, 1), jnp.float32),
    }


def _round_up(a, b):
    return ((a + b - 1) // b) * b


def pack_u_embedding_params(params):
    """Pack + cast weights to bf16 once (do this at init, not per call)."""
    w1u, b1u = params["w1u"], params["b1u"]
    w2u, b2u = params["w2u"], params["b2u"]
    w1, b1 = params["w1"], params["b1"]
    w2, b2 = params["w2"], params["b2"]
    w3, b3 = params["w3"], params["b3"]
    h2 = w1u.shape[0]
    h = w1.shape[0]
    oc = w3.shape[0]
    slab_rows = _round_up(oc + 1, 8)

    # Layer 1: [[w1u | b1u], [w1 | b1]]                      -> (h2+h, s+1)
    w1c = jnp.concatenate([
        jnp.concatenate([w1u, b1u], axis=1),
        jnp.concatenate([w1, b1], axis=1),
    ], axis=0)

    # Layer 2: rows 0:h = [0 | w2 | b2]; row h = [w2u | 0 | b2u]
    #                                                        -> (h+1, h2+h+1)
    top = jnp.concatenate([jnp.zeros((h, h2), w2.dtype), w2, b2], axis=1)
    bot = jnp.concatenate([w2u, jnp.zeros((1, h), w2u.dtype), b2u], axis=1)
    w2c = jnp.concatenate([top, bot], axis=0)

    # Layer 3: rows 0:oc = [w3 | b3]; rows oc:slab_rows = 0  -> (slab_rows, h+1)
    w3c = jnp.concatenate([w3, b3], axis=1)
    w3c = jnp.pad(w3c, ((0, slab_rows - oc), (0, 0)))

    return {"w1c": w1c.astype(jnp.bfloat16),
            "w2c": w2c.astype(jnp.bfloat16),
            "w3c": w3c.astype(jnp.bfloat16)}


# ----------------------------------------------------------------------------
# Tiling: row tile = lane dim of every block (multiple of 128 or full extent).
# Small/medium M -> one full tile (best on single-TC v5e/v6e); large M ->
# tile_m-sized tiles with an EVEN grid so v7x's two TensorCores both work.
# ----------------------------------------------------------------------------
def _choose_tile(M, tile_m):
    tile_m = max(128, _round_up(tile_m, 128))
    m128 = _round_up(max(M, 1), 128)
    if m128 <= tile_m:
        return m128, m128
    n = pl.cdiv(m128, tile_m)
    if n % 2:                       # keep the grid even for v7x megacore parity
        n += 1
        tile_m = _round_up(pl.cdiv(m128, n), 128)
    return tile_m, n * tile_m


# ----------------------------------------------------------------------------
# Wrapper: jitted end-to-end so layout plumbing fuses with the kernel call.
# ----------------------------------------------------------------------------
@functools.partial(jax.jit, static_argnames=("c", "output_size", "tile_m"))
def u_embedding_forward(x, packed, *, c, output_size, temp=1.0, tile_m=4096):
    """x: [BT, N, s] float32.  Returns (g_u, u, u_logits) like the PyTorch module."""
    BT, N, s = x.shape
    M = BT * N
    w1c, w2c, w3c = packed["w1c"], packed["w2c"], packed["w3c"]
    h = w2c.shape[0] - 1
    h2 = w2c.shape[1] - 1 - h
    slab_rows = w3c.shape[0]
    oc = output_size * c
    assert w1c.shape == (h2 + h, s + 1) and w3c.shape == (slab_rows, h + 1)
    assert slab_rows >= oc + 1

    tm, M_pad = _choose_tile(M, tile_m)
    grid = (M_pad // tm,)

    # bf16 cast + ones column (layer-1 bias) + row pad, THEN transpose.
    xr = x.reshape(M, s).astype(jnp.bfloat16)
    x_aug = jnp.concatenate([xr, jnp.ones((M, 1), jnp.bfloat16)], axis=1)
    if M_pad != M:
        x_aug = jnp.pad(x_aug, ((0, M_pad - M), (0, 0)))
    xT = jnp.transpose(x_aug)                                  # (s+1, M_pad)

    kernel = _make_kernel(h2, h, oc, slab_rows)

    slab = pl.pallas_call(
        kernel,
        out_shape=jax.ShapeDtypeStruct((slab_rows, M_pad), jnp.float32),
        grid_spec=pltpu.PrefetchScalarGridSpec(
            num_scalar_prefetch=0,
            grid=grid,
            in_specs=[
                pl.BlockSpec((s + 1, tm), lambda i: (0, i)),          # x^T
                pl.BlockSpec((h2 + h, s + 1), lambda i: (0, 0)),      # W1c
                pl.BlockSpec((h + 1, h2 + h + 1), lambda i: (0, 0)),  # W2c
                pl.BlockSpec((slab_rows, h + 1), lambda i: (0, 0)),   # W3c
            ],
            out_specs=pl.BlockSpec((slab_rows, tm), lambda i: (0, i)),
        ),
        compiler_params=pltpu.CompilerParams(
            dimension_semantics=("parallel",),
        ),
    )(xT, w1c, w2c, w3c)

    # Output plumbing stays under the same jit -> fuses into one pass.
    enc = jnp.transpose(slab[:oc, :M])                         # (M, oc)
    u_logits = slab[oc, :M].reshape(BT, N, 1)
    g_u = enc.reshape(M, c, output_size)                       # (-1, c, u_dim)
    u = jax.nn.sigmoid(u_logits / temp)                        # gate in wrapper
    return g_u, u, u_logits


# ----------------------------------------------------------------------------
# Pure-JAX references (mirror the PyTorch forward, unpacked params)
# ----------------------------------------------------------------------------
def _ref_forward(x, params, c, output_size, temp, lin):
    BT, N, _ = x.shape
    h_u = jnp.maximum(lin(x, params["w1u"], params["b1u"]), 0.0)
    u_logits = lin(h_u, params["w2u"], params["b2u"])
    h1 = jnp.maximum(lin(x, params["w1"], params["b1"]), 0.0)
    h2 = jnp.maximum(lin(h1, params["w2"], params["b2"]), 0.0)
    enc = jnp.tanh(lin(h2, params["w3"], params["b3"]))
    g_u = enc.reshape(BT * N, c, output_size)
    u = jax.nn.sigmoid(u_logits / temp)
    return g_u, u, u_logits


def u_embedding_ref_bf16(x, params, c, output_size, temp=1.0):
    # Same bf16-input / f32-accumulation recipe as the kernel.
    def lin(v, w, b):
        return jnp.dot(v.astype(jnp.bfloat16), w.astype(jnp.bfloat16).T,
                       preferred_element_type=jnp.float32) + b[:, 0]
    return _ref_forward(x, params, c, output_size, temp, lin)


def u_embedding_ref_f32(x, params, c, output_size, temp=1.0):
    def lin(v, w, b):
        return jnp.dot(v, w.T) + b[:, 0]
    return _ref_forward(x, params, c, output_size, temp, lin)


# ----------------------------------------------------------------------------
# Self-test
# ----------------------------------------------------------------------------
if __name__ == "__main__":
    hidden_size, output_size, c = 32, 4, 3
    s = 16
    temp = 1.0

    key = jax.random.PRNGKey(0)
    k_param, k_x = jax.random.split(key)
    params = init_u_embedding_params(k_param, s, c, hidden_size, output_size)
    packed = pack_u_embedding_params(params)
    packed = jax.tree_util.tree_map(jax.block_until_ready, packed)

    def check(BT, N, tile_m=4096):
        kx = jax.random.fold_in(k_x, BT * 1000 + N)
        x = jax.random.normal(kx, (BT, N, s), dtype=jnp.float32)

        g_u, u, ul = u_embedding_forward(x, packed, c=c, output_size=output_size,
                                         temp=temp, tile_m=tile_m)
        jax.block_until_ready((g_u, u, ul))

        assert g_u.shape == (BT * N, c, output_size)
        assert u.shape == (BT, N, 1)
        assert ul.shape == (BT, N, 1)

        # tight check against a bf16-matched reference
        g_b, u_b, ul_b = u_embedding_ref_bf16(x, params, c, output_size, temp)
        assert jnp.allclose(g_u, g_b, atol=5e-3, rtol=5e-3)
        assert jnp.allclose(u, u_b, atol=5e-3, rtol=5e-3)
        assert jnp.allclose(ul, ul_b, atol=5e-3, rtol=5e-3)

        # relaxed sanity check against the full-f32 reference
        g_f, u_f, ul_f = u_embedding_ref_f32(x, params, c, output_size, temp)
        assert jnp.allclose(g_u, g_f, atol=1e-1, rtol=1e-1)
        assert jnp.allclose(u, u_f, atol=1e-1, rtol=1e-1)
        assert jnp.allclose(ul, ul_f, atol=1e-1, rtol=1e-1)

    # Small shapes consistent with the module: BT=2, N=8, s=16 -> single tile.
    check(2, 8)
    # Medium M: single full tile (v6e/v5e best path), lane-dense padded to 384.
    check(3, 100)     # M = 300  -> tile 384, grid=(1,)
    # Large M: multi-tile, even grid (both v7x TensorCores), row padding.
    check(128, 70)    # M = 8960 -> tile 2304, grid=(4,), padded to 9216

    print("KERNEL_OK")
</pallas_src>

<mosaic_0001>
module attributes {stable_mosaic.version = 11 : i64} {
  func.func @kernel(%arg0: i32, %arg1: memref<17x128xbf16, #tpu.memory_space<vmem>>, %arg2: memref<48x17xbf16, #tpu.memory_space<vmem>>, %arg3: memref<33x49xbf16, #tpu.memory_space<vmem>>, %arg4: memref<16x33xbf16, #tpu.memory_space<vmem>>, %arg5: memref<16x128xf32, #tpu.memory_space<vmem>>) attributes {dimension_semantics = [#tpu.dimension_semantics<parallel>], iteration_bounds = array<i64: 1>, scalar_prefetch = 0 : i64, scratch_operands = 0 : i64, tpu.core_type = #tpu.core_type<tc>, window_params = [{transform_indices = @transform_0, window_bounds = array<i64: 17, 128>}, {pipeline_mode = #tpu.pipeline_mode<synchronous>, transform_indices = @transform_1, window_bounds = array<i64: 48, 17>}, {pipeline_mode = #tpu.pipeline_mode<synchronous>, transform_indices = @transform_2, window_bounds = array<i64: 33, 49>}, {pipeline_mode = #tpu.pipeline_mode<synchronous>, transform_indices = @transform_3, window_bounds = array<i64: 16, 33>}, {transform_indices = @transform_4, window_bounds = array<i64: 16, 128>}]} {
    %c0 = arith.constant 0 : index
    %c0_0 = arith.constant 0 : index
    %0 = vector.load %arg1[%c0, %c0_0] : memref<17x128xbf16, #tpu.memory_space<vmem>>, vector<17x128xbf16>
    %c0_1 = arith.constant 0 : index
    %c0_2 = arith.constant 0 : index
    %1 = vector.load %arg2[%c0_1, %c0_2] : memref<48x17xbf16, #tpu.memory_space<vmem>>, vector<48x17xbf16>
    %cst = arith.constant dense<0.000000e+00> : vector<48x128xf32>
    %2 = tpu.matmul %1, %0, %cst {dimension_numbers = #tpu.dot_dimension_numbers<[1], [0], [0], [1], [0, 0, 1, 1], [], []>} : vector<48x17xbf16>, vector<17x128xbf16>, vector<48x128xf32> -> vector<48x128xf32>
    %cst_3 = arith.constant 0.000000e+00 : f32
    %3 = vector.broadcast %cst_3 : f32 to vector<48x128xf32>
    %4 = arith.maximumf %2, %3 : vector<48x128xf32>
    %c0_4 = arith.constant 0 : index
    %c0_5 = arith.constant 0 : index
    %5 = vector.load %arg3[%c0_4, %c0_5] : memref<33x49xbf16, #tpu.memory_space<vmem>>, vector<33x49xbf16>
    %6 = vector.extract_strided_slice %5 {offsets = [0, 0], sizes = [33, 48], strides = [1, 1]} : vector<33x49xbf16> to vector<33x48xbf16>
    %7 = arith.truncf %4 : vector<48x128xf32> to vector<48x128xbf16>
    %cst_6 = arith.constant dense<0.000000e+00> : vector<33x128xf32>
    %8 = tpu.matmul %6, %7, %cst_6 {dimension_numbers = #tpu.dot_dimension_numbers<[1], [0], [0], [1], [0, 0, 1, 1], [], []>} : vector<33x48xbf16>, vector<48x128xbf16>, vector<33x128xf32> -> vector<33x128xf32>
    %9 = vector.extract_strided_slice %5 {offsets = [0, 48], sizes = [33, 1], strides = [1, 1]} : vector<33x49xbf16> to vector<33x1xbf16>
    %10 = arith.extf %9 : vector<33x1xbf16> to vector<33x1xf32>
    %11 = vector.broadcast %10 : vector<33x1xf32> to vector<33x128xf32>
    %12 = arith.addf %8, %11 : vector<33x128xf32>
    %13 = vector.extract_strided_slice %12 {offsets = [32, 0], sizes = [1, 128], strides = [1, 1]} : vector<33x128xf32> to vector<1x128xf32>
    %14 = vector.extract_strided_slice %12 {offsets = [0, 0], sizes = [32, 128], strides = [1, 1]} : vector<33x128xf32> to vector<32x128xf32>
    %cst_7 = arith.constant 0.000000e+00 : f32
    %15 = vector.broadcast %cst_7 : f32 to vector<32x128xf32>
    %16 = arith.maximumf %14, %15 : vector<32x128xf32>
    %c0_8 = arith.constant 0 : index
    %c0_9 = arith.constant 0 : index
    %17 = vector.load %arg4[%c0_8, %c0_9] : memref<16x33xbf16, #tpu.memory_space<vmem>>, vector<16x33xbf16>
    %18 = vector.extract_strided_slice %17 {offsets = [0, 0], sizes = [16, 32], strides = [1, 1]} : vector<16x33xbf16> to vector<16x32xbf16>
    %19 = arith.truncf %16 : vector<32x128xf32> to vector<32x128xbf16>
    %cst_10 = arith.constant dense<0.000000e+00> : vector<16x128xf32>
    %20 = tpu.matmul %18, %19, %cst_10 {dimension_numbers = #tpu.dot_dimension_numbers<[1], [0], [0], [1], [0, 0, 1, 1], [], []>} : vector<16x32xbf16>, vector<32x128xbf16>, vector<16x128xf32> -> vector<16x128xf32>
    %21 = vector.extract_strided_slice %17 {offsets = [0, 32], sizes = [16, 1], strides = [1, 1]} : vector<16x33xbf16> to vector<16x1xbf16>
    %22 = arith.extf %21 : vector<16x1xbf16> to vector<16x1xf32>
    %23 = vector.broadcast %22 : vector<16x1xf32> to vector<16x128xf32>
    %24 = arith.addf %20, %23 : vector<16x128xf32>
    %25 = math.tanh %24 : vector<16x128xf32>
    %26 = tpu.iota {dimensions = array<i32: 0>} : vector<16x128xi32>
    %c12_i32 = arith.constant 12 : i32
    %27 = vector.broadcast %c12_i32 : i32 to vector<16x128xi32>
    %28 = arith.cmpi eq, %26, %27 : vector<16x128xi32>
    %29 = vector.shape_cast %13 : vector<1x128xf32> to vector<1x128xf32>
    %30 = vector.broadcast %29 : vector<1x128xf32> to vector<16x128xf32>
    %31 = arith.select %28, %30, %25 : vector<16x128xi1>, vector<16x128xf32>
    %c0_11 = arith.constant 0 : index
    %c0_12 = arith.constant 0 : index
    %32 = vector.load %arg5[%c0_11, %c0_12] : memref<16x128xf32, #tpu.memory_space<vmem>>, vector<16x128xf32>
    tpu.vector_store %arg5[%c0_11, %c0_12], %31 {strides = array<i32>} : memref<16x128xf32, #tpu.memory_space<vmem>>, vector<16x128xf32>,
    return
  }
  func.func @transform_0(%arg0: i32) -> (i32, i32) {
    %c0_i32 = arith.constant 0 : i32
    %c0_i32_0 = arith.constant 0 : i32
    return %c0_i32, %arg0 : i32, i32
  }
  func.func @transform_1(%arg0: i32) -> (i32, i32) {
    %c0_i32 = arith.constant 0 : i32
    %c0_i32_0 = arith.constant 0 : i32
    %c0_i32_1 = arith.constant 0 : i32
    return %c0_i32, %c0_i32_0 : i32, i32
  }
  func.func @transform_2(%arg0: i32) -> (i32, i32) {
    %c0_i32 = arith.constant 0 : i32
    %c0_i32_0 = arith.constant 0 : i32
    %c0_i32_1 = arith.constant 0 : i32
    return %c0_i32, %c0_i32_0 : i32, i32
  }
  func.func @transform_3(%arg0: i32) -> (i32, i32) {
    %c0_i32 = arith.constant 0 : i32
    %c0_i32_0 = arith.constant 0 : i32
    %c0_i32_1 = arith.constant 0 : i32
    return %c0_i32, %c0_i32_0 : i32, i32
  }
  func.func @transform_4(%arg0: i32) -> (i32, i32) {
    %c0_i32 = arith.constant 0 : i32
    %c0_i32_0 = arith.constant 0 : i32
    return %c0_i32, %arg0 : i32, i32
  }
}

</mosaic_0001>

<bundles_post_ra>
// kernel: u_embedding_forward.1
= control target key start
LH: loop header
LB: loop body
LE: loop exit
PB: predicated region body
PF: predicated region fallthrough
CT: control target
= control target key end

     0   :  { %vm61_vm0 = vcmask 1040384   ;;  %v454_v0 = vmov 0.0   ;;  %v455_v2 = vmov 0   ;;  %vm456_vm1 = vmmov 0   ;;  %s538_s0 = inlined_call_operand.vmem [shape: bf16[17,128], index: 0, kind: input, shape index: {}]   ;;  %s539_s1 = inlined_call_operand.vmem [shape: bf16[48,17], index: 1, kind: input, shape index: {}]   ;;  %s540_s2 = inlined_call_operand.vmem [shape: bf16[33,49], index: 2, kind: input, shape index: {}]   ;;  %s541_s3 = inlined_call_operand.vmem [shape: bf16[16,33], index: 3, kind: input, shape index: {}]   ;;  %s542_s4 = inlined_call_operand.vmem [shape: f32[16,128], index: 4, kind: output, shape index: {}]  }
   0x1   :  { %366 = vmatprep.subr.bf16.mxu0 %v454_v0  ;;  %v432_v1 = vld [vmem:[%s538_s0] sm:$0xff]   ;;  %v63_v3 = vsel %vm61_vm0, 65535, %v455_v2  ;;  %370 = vmatprep.mubr.msk.bf16.mxu0 %vm456_vm1, %v454_v0  ;;  %v433_v4 = vld [vmem:[%s538_s0 + $0x8] ss:$0 sps:$4 sm:$0x11]   ;;  %vm51_vm2 = vcmask 138240  }
   0x2   :  { %382 = vmatprep.subr.bf16.mxu1 %v454_v0  ;;  %388 = vmatprep.mubr.msk.bf16.mxu1 %vm456_vm1, %v454_v0  ;;  %v65_v5 = vand.u32 %v433_v4, %v63_v3  ;;  %v434_v6 = vld [vmem:[%s539_s1] sm:$0xff]   ;;  %v435_v7 = vld [vmem:[%s539_s1 + $0x8] sm:$0xff]   ;;  %v436_v8 = vld [vmem:[%s539_s1 + $0x10] sm:$0xff]   ;;  %v457_v14 = vmov 48   ;;  %vm181_vm3 = vcmask 392192   ;;  %v458_v44 = vmov 32  }
   0x3   :  { %367 = vmatpush3.bf16.msra.mxu0 %v432_v1  ;;  %v130_v9 = vld [vmem:[%s540_s2] sm:$0xff]   ;;  %v132_v10 = vld [vmem:[%s540_s2 + $0x8] sm:$0xff]   ;;  %413 = vset.pattern.permute.xlu0 %v457_v14  ;;  %v134_v40 = vld [vmem:[%s540_s2 + $0x10] sm:$0x1]  ;;  %vm272_vm4 = vcmask 261120  }
   0x4   :  { %368 = vmatprep.subr.bf16.mxu0 %v454_v0  ;;  %v138_v11 = vunpack.c.l.bf16 %v130_v9  ;;  %v139_v12 = vunpack.c.h.bf16 %v130_v9  ;;  %v140_v13 = vunpack.c.l.bf16 %v132_v10  ;;  %v141_v15 = vunpack.c.h.bf16 %v132_v10  ;;  %v251_v39 = vld [vmem:[%s541_s3] sm:$0xff]   ;;  %424 = vset.pattern.permute.xlu1 %v458_v44 }
   0x5   :  { %v255_v41 = vunpack.c.l.bf16 %v251_v39  ;;  %v256_v42 = vunpack.c.h.bf16 %v251_v39  ;;  %v346_v43 = vcombine.low %v134_v40, %v134_v40  ;;  %v142_v46 = vunpack.c.l.bf16 %v134_v40 }
   0x6   :  { %v414_v16 = vpack.i.bf16 %v139_v12, %v138_v11  ;;  %v419_v17 = vpack.i.bf16 %v141_v15, %v140_v13 }
   0x7   :  { %369 = vmatpush3.bf16.msra.mxu0 %v65_v5  ;;  %v425_v45 = vpack.i.bf16 %v255_v41, %v256_v42 }
   0x8   :  { %400 = vmatprep.subr.bf16.mxu0 %v454_v0  ;;  %415 = vperm.xlu0 %413, %v414_v16  }
   0x9   :  { %426 = vperm.xlu1 %424, %v425_v45  }
   0xa   :  { %371 = vmatmul.mubr.msk.bf16.vlgmr.msra.gmra.mrb[0].mxu0 %vm51_vm2, %v434_v6 }
   0xb   :  { %374 = vmatprep.mubr.msk.bf16.mxu0 %vm456_vm1, %v454_v0 }
   0xc   :  { %420 = vperm.xlu0 %413, %v419_v17  }
   0xd   :  { %430 = vset.pattern.permute.xlu1 %v457_v14 }
   0xe   :  { %165 = vperm.xlu1 %430, %v142_v46  }
  0x10   :  { %431 = vset.pattern.permute.xlu0 %v458_v44 }
  0x12   :  { %375 = vmatmul.mubr.msk.bf16.gmra.mrb[4].mxu0 %vm51_vm2, %v435_v7 }
  0x13   :  { %378 = vmatprep.mubr.msk.bf16.mxu0 %vm456_vm1, %v454_v0 }
  0x1a   :  { %379 = vmatmul.mubr.msk.bf16.gmra.mrb[8].mxu0 %vm51_vm2, %v436_v8 }
  0x1b   :  { %404 = vmatprep.mubr.msk.bf16.mxu0 %vm456_vm1, %v454_v0 }
  0x87   :  { %v416_v47 = vpop.permute.xlu0 %415 }
  0x88   :  { %v427_v8 = vpop.permute.xlu1 %426 }
  0x8b   :  { %v421_v54 = vpop.permute.xlu0 %420 }
  0x8d   :  { %v166_v16 = vpop.permute.xlu1 %165 }
  0xdd   :  { %v101_v18 = vpop.f32.mrb[0].mxu0 }
  0xde   :  { %v372_v19 = vpop.f32.mrb[1].mxu0  ;;  %v124_v21 = vmax.f32 %v101_v18, 0.0 }
  0xdf   :  { %v104_v20 = vpop.f32.mrb[2].mxu0 }
  0xe0   :  { %v125_v22 = vmax.f32 %v104_v20, 0.0  ;;  %v373_v23 = vpop.f32.mrb[3].mxu0 }
  0xe2   :  { %v135_v24 = vpack.c.bf16 %v125_v22, %v124_v21 }
  0xe4   :  { %383 = vmatpush3.bf16.msra.mxu1 %v135_v24 }
  0xe5   :  { %v109_v25 = vpop.f32.mrb[4].mxu0  ;;  %384 = vmatprep.subr.bf16.mxu1 %v454_v0 }
  0xe6   :  { %v376_v26 = vpop.f32.mrb[5].mxu0  ;;  %v126_v28 = vmax.f32 %v109_v25, 0.0 }
  0xe7   :  { %v112_v27 = vpop.f32.mrb[6].mxu0 }
  0xe8   :  { %v127_v29 = vmax.f32 %v112_v27, 0.0  ;;  %v377_v30 = vpop.f32.mrb[7].mxu0 }
  0xea   :  { %v136_v31 = vpack.c.bf16 %v127_v29, %v126_v28 }
  0xec   :  { %385 = vmatpush3.bf16.msra.mxu1 %v136_v31 }
  0xed   :  { %v117_v32 = vpop.f32.mrb[8].mxu0  ;;  %386 = vmatprep.subr.bf16.mxu1 %v454_v0 }
  0xee   :  { %v380_v33 = vpop.f32.mrb[9].mxu0  ;;  %v128_v35 = vmax.f32 %v117_v32, 0.0 }
  0xef   :  { %v120_v34 = vpop.f32.mrb[10].mxu0 }
  0xf0   :  { %v129_v36 = vmax.f32 %v120_v34, 0.0  ;;  %v381_v37 = vpop.f32.mrb[11].mxu0 }
  0xf2   :  { %v137_v38 = vpack.c.bf16 %v129_v36, %v128_v35 }
  0xf4   :  { %387 = vmatpush3.bf16.msra.mxu1 %v137_v38 }
  0xf7   :  { %389 = vmatmul.mubr.msk.bf16.vlgmr.msra.gmra.mrb[0].mxu1 %vm181_vm3, %v130_v9 }
  0xf8   :  { %392 = vmatprep.mubr.msk.bf16.mxu1 %vm456_vm1, %v454_v0 }
  0xff   :  { %393 = vmatmul.mubr.msk.bf16.gmra.mrb[4].mxu1 %vm181_vm3, %v132_v10  ;;  %v319_v10 = vlaneseq }
 0x100   :  { %396 = vmatprep.mubr.msk.bf16.mxu1 %vm456_vm1, %v454_v0 }
 0x101   :  { %v320_v15 = vshrl.u32 %v319_v10, 7 }
 0x103   :  { %v326_v17 = vsub.s32 0, %v320_v15  ;;  %v321_v19 = vadd.s32 8, %v320_v15 }
 0x105   :  { %vm323_vm5 = vcmp.eq.s32.totalorder %v321_v19, 12 }
 0x107   :  { %397 = vmatmul.mubr.msk.bf16.gmra.mrb[8].mxu1 %vm181_vm3, %v346_v43 }
 0x1ca   :  { %v225_v48 = vpop.f32.mrb[0].mxu1 }
 0x1cb   :  { %v448_v49 = vadd.low.f32.bf16 %v225_v48, %v416_v47  ;;  %v390_v50 = vpop.f32.mrb[1].mxu1 }
 0x1cc   :  { %v228_v51 = vpop.f32.mrb[2].mxu1 }
 0x1cd   :  { %v449_v52 = vadd.high.f32.bf16 %v228_v51, %v416_v47  ;;  %v391_v53 = vpop.f32.mrb[3].mxu1  ;;  %v247_v55 = vmax.f32 %v448_v49, 0.0 }
 0x1cf   :  { %v248_v56 = vmax.f32 %v449_v52, 0.0 }
 0x1d1   :  { %v253_v57 = vpack.c.bf16 %v248_v56, %v247_v55 }
 0x1d2   :  { %v233_v58 = vpop.f32.mrb[4].mxu1 }
 0x1d3   :  { %v450_v59 = vadd.low.f32.bf16 %v233_v58, %v421_v54  ;;  %v394_v60 = vpop.f32.mrb[5].mxu1  ;;  %401 = vmatpush3.bf16.msra.mxu0 %v253_v57 }
 0x1d4   :  { %v236_v61 = vpop.f32.mrb[6].mxu1  ;;  %402 = vmatprep.subr.bf16.mxu0 %v454_v0 }
 0x1d5   :  { %v451_v62 = vadd.high.f32.bf16 %v236_v61, %v421_v54  ;;  %v395_v63 = vpop.f32.mrb[7].mxu1  ;;  %v249_v1 = vmax.f32 %v450_v59, 0.0 }
 0x1d7   :  { %v250_v2 = vmax.f32 %v451_v62, 0.0 }
 0x1d9   :  { %v254_v3 = vpack.c.bf16 %v250_v2, %v249_v1 }
 0x1da   :  { %v241_v4 = vpop.f32.mrb[8].mxu1 }
 0x1db   :  { %403 = vmatpush3.bf16.msra.mxu0 %v254_v3  ;;  %v398_v5 = vpop.f32.mrb[9].mxu1  ;;  %v242_v18 = vadd.f32 %v241_v4, %v166_v16 }
 0x1dc   :  { %v244_v6 = vpop.f32.mrb[10].mxu1 }
 0x1dd   :  { %v399_v7 = vpop.f32.mrb[11].mxu1  ;;  %v327_v20 = vrot.slane %v242_v18, %v326_v17 }
 0x1de   :  { %405 = vmatmul.mubr.msk.bf16.vlgmr.msra.gmra.mrb[12].mxu0 %vm272_vm4, %v251_v39 }
 0x2b1   :  { %v310_v9 = vpop.f32.mrb[12].mxu0 }
 0x2b2   :  { %v452_v11 = vadd.high.f32.bf16 %v310_v9, %v427_v8  ;;  %v406_v12 = vpop.f32.mrb[13].mxu0 }
 0x2b3   :  { %v313_v13 = vpop.f32.mrb[14].mxu0 }
 0x2b4   :  { %444 = vtanh.f32 %v452_v11  ;;  %v453_v0 = vadd.low.f32.bf16 %v313_v13, %v427_v8  ;;  %v407_v14 = vpop.f32.mrb[15].mxu0 }
 0x2b6   :  { %446 = vtanh.f32 %v453_v0 }
 0x2be   :  { %v445_v21 = vpop.eup %444 }
 0x2bf   :  { %330 = vst [vmem:[%s542_s4] sm:$0xff] %v445_v21 }
 0x2c0   :  { %v447_v22 = vpop.eup %446 }
 0x2c1   :  { %v329_v23 = vsel %vm323_vm5, %v327_v20, %v447_v22 }
 0x2c2   :  { %331 = vst [vmem:[%s542_s4 + $0x8] sm:$0xff] %v329_v23 }

</bundles_post_ra>
